<compile_context>
chip_gen: v7x
topology: tpu7x:2x2x1
jax: 0.10.0
libtpu: 0.0.40
codegen_flags: <defaults>
</compile_context>

<pallas_src>
import math
import jax
import jax.numpy as jnp
from jax.experimental import pallas as pl
from jax.experimental.pallas import tpu as pltpu

_LANE = 128   # lane width (last-dim tiling unit)
_SUB = 8      # sublane width (second-to-last-dim tiling unit)


def _popart_kernel(x_ref, wt_ref, b_ref, sigma_ref, mu_ref, pred_ref, unnorm_ref):
    # x:            [TB, F_in]
    # wt (= W.T):   [F_in, F_out_pad]   (resident across all batch tiles)
    # b/sigma/mu:   [1, F_out_pad]      (broadcast over the batch tile)
    norm = jnp.dot(x_ref[...], wt_ref[...], preferred_element_type=jnp.float32)
    norm = norm + b_ref[...]                     # broadcasted add over batch rows
    pred_ref[...] = norm.astype(pred_ref.dtype)
    # unnormalized prediction (torch.no_grad branch): norm * sigma + mu
    unnorm_ref[...] = (norm * sigma_ref[...] + mu_ref[...]).astype(unnorm_ref.dtype)


def popart_forward(x, weight, bias, sigma, mu, *, block_b=512):
    """x: [B, F_in], weight: [F_out, F_in], bias/sigma/mu: [F_out].

    Returns dict with 'pred' and 'unnormalized_pred' (each [B, F_out], squeezed
    to [B] when F_out == 1, matching torch's .squeeze(1) behaviour).
    """
    B, F_in = x.shape
    F_out = weight.shape[0]

    # ---- wrapper-side (one-time) layout prep -------------------------------
    # Lane-dense padded output width (full unmasked vector stores in-kernel).
    F_out_p = pl.cdiv(F_out, _LANE) * _LANE
    # Batch tile: multiple of 8 sublanes, capped at block_b.
    TB = min(block_b, pl.cdiv(B, _SUB) * _SUB)
    B_p = pl.cdiv(B, TB) * TB
    nb = B_p // TB

    xp = x if B_p == B else jnp.pad(x, ((0, B_p - B), (0, 0)))

    # Pre-transpose weight once: [F_out, F_in] -> [F_in, F_out_p] (zero-padded).
    wT = jnp.zeros((F_in, F_out_p), weight.dtype).at[:, :F_out].set(weight.T)

    def _pad_row(v):
        return jnp.zeros((1, F_out_p), v.dtype).at[0, :F_out].set(v)

    b2, s2, m2 = _pad_row(bias), _pad_row(sigma), _pad_row(mu)

    # ---- tiled, pipelined pallas_call --------------------------------------
    pred, unnorm = pl.pallas_call(
        _popart_kernel,
        out_shape=(
            jax.ShapeDtypeStruct((B_p, F_out_p), jnp.float32),
            jax.ShapeDtypeStruct((B_p, F_out_p), jnp.float32),
        ),
        grid_spec=pltpu.PrefetchScalarGridSpec(
            num_scalar_prefetch=0,
            grid=(nb,),
            in_specs=[
                pl.BlockSpec((TB, F_in), lambda i: (i, 0)),        # x tile
                pl.BlockSpec((F_in, F_out_p), lambda i: (0, 0)),   # W.T (constant)
                pl.BlockSpec((1, F_out_p), lambda i: (0, 0)),      # bias
                pl.BlockSpec((1, F_out_p), lambda i: (0, 0)),      # sigma
                pl.BlockSpec((1, F_out_p), lambda i: (0, 0)),      # mu
            ],
            out_specs=(
                pl.BlockSpec((TB, F_out_p), lambda i: (i, 0)),
                pl.BlockSpec((TB, F_out_p), lambda i: (i, 0)),
            ),
        ),
        compiler_params=pltpu.CompilerParams(
            dimension_semantics=("parallel",),
        ),
    )(xp, wT, b2, s2, m2)

    # Strip batch / lane padding.
    pred = pred[:B, :F_out]
    unnorm = unnorm[:B, :F_out]

    # torch .squeeze(1): only drops dim 1 when its size is 1
    if F_out == 1:
        pred = pred.reshape(B)
        unnorm = unnorm.reshape(B)
    # TODO(synk): torch.no_grad() semantics on the unnormalized branch only
    # matter for autodiff; irrelevant for this forward-only kernel.
    return {"pred": pred, "unnormalized_pred": unnorm}


if __name__ == "__main__":
    key = jax.random.PRNGKey(0)

    # ---- case 1: F_out > 1 --------------------------------------------------
    B, F_in, F_out = 8, 32, 8
    k_x, k_w, k_b = jax.random.split(key, 3)

    # kaiming_uniform_(a=sqrt(5)) on [F_out, F_in] -> U(-1/sqrt(fan_in), 1/sqrt(fan_in))
    bound = 1.0 / math.sqrt(F_in)
    weight = jax.random.uniform(k_w, (F_out, F_in), jnp.float32, -bound, bound)
    bias = jax.random.uniform(k_b, (F_out,), jnp.float32, -bound, bound)
    mu = jnp.zeros((F_out,), jnp.float32)
    sigma = jnp.ones((F_out,), jnp.float32)
    x = jax.random.normal(k_x, (B, F_in), jnp.float32)

    out = popart_forward(x, weight, bias, sigma, mu)
    jax.block_until_ready(out)

    ref_pred = x @ weight.T + bias[None, :]
    ref_unnorm = ref_pred * sigma[None, :] + mu[None, :]
    assert out["pred"].shape == (B, F_out)
    assert jnp.allclose(out["pred"], ref_pred, atol=1e-5, rtol=1e-5)
    assert jnp.allclose(out["unnormalized_pred"], ref_unnorm, atol=1e-5, rtol=1e-5)

    # ---- case 2: F_out == 1 (squeeze path), batch not a multiple of 8 -------
    B2, F_out2 = 10, 1
    k_x2, k_w2, k_b2 = jax.random.split(jax.random.PRNGKey(1), 3)
    weight2 = jax.random.uniform(k_w2, (F_out2, F_in), jnp.float32, -bound, bound)
    bias2 = jax.random.uniform(k_b2, (F_out2,), jnp.float32, -bound, bound)
    mu2 = 0.3 * jnp.ones((F_out2,), jnp.float32)
    sigma2 = 2.0 * jnp.ones((F_out2,), jnp.float32)
    x2 = jax.random.normal(k_x2, (B2, F_in), jnp.float32)

    out2 = popart_forward(x2, weight2, bias2, sigma2, mu2)
    jax.block_until_ready(out2)

    ref_pred2 = (x2 @ weight2.T + bias2[None, :]).reshape(B2)
    ref_unnorm2 = ref_pred2 * sigma2[0] + mu2[0]
    assert out2["pred"].shape == (B2,)
    assert jnp.allclose(out2["pred"], ref_pred2, atol=1e-5, rtol=1e-5)
    assert jnp.allclose(out2["unnormalized_pred"], ref_unnorm2, atol=1e-5, rtol=1e-5)

    print("KERNEL_OK")
</pallas_src>

<mosaic_0001>
module attributes {stable_mosaic.version = 11 : i64} {
  func.func @_popart_kernel(%arg0: i32, %arg1: memref<8x32xf32, #tpu.memory_space<vmem>>, %arg2: memref<32x128xf32, #tpu.memory_space<vmem>>, %arg3: memref<1x128xf32, #tpu.memory_space<vmem>>, %arg4: memref<1x128xf32, #tpu.memory_space<vmem>>, %arg5: memref<1x128xf32, #tpu.memory_space<vmem>>, %arg6: memref<8x128xf32, #tpu.memory_space<vmem>>, %arg7: memref<8x128xf32, #tpu.memory_space<vmem>>) attributes {dimension_semantics = [#tpu.dimension_semantics<parallel>], iteration_bounds = array<i64: 1>, scalar_prefetch = 0 : i64, scratch_operands = 0 : i64, tpu.core_type = #tpu.core_type<tc>, window_params = [{transform_indices = @transform_0, window_bounds = array<i64: 8, 32>}, {pipeline_mode = #tpu.pipeline_mode<synchronous>, transform_indices = @transform_1, window_bounds = array<i64: 32, 128>}, {pipeline_mode = #tpu.pipeline_mode<synchronous>, transform_indices = @transform_2, window_bounds = array<i64: 1, 128>}, {pipeline_mode = #tpu.pipeline_mode<synchronous>, transform_indices = @transform_3, window_bounds = array<i64: 1, 128>}, {pipeline_mode = #tpu.pipeline_mode<synchronous>, transform_indices = @transform_4, window_bounds = array<i64: 1, 128>}, {transform_indices = @transform_5, window_bounds = array<i64: 8, 128>}, {transform_indices = @transform_6, window_bounds = array<i64: 8, 128>}]} {
    %c0 = arith.constant 0 : index
    %c0_0 = arith.constant 0 : index
    %0 = vector.load %arg1[%c0, %c0_0] : memref<8x32xf32, #tpu.memory_space<vmem>>, vector<8x32xf32>
    %c0_1 = arith.constant 0 : index
    %c0_2 = arith.constant 0 : index
    %1 = vector.load %arg2[%c0_1, %c0_2] : memref<32x128xf32, #tpu.memory_space<vmem>>, vector<32x128xf32>
    %cst = arith.constant dense<0.000000e+00> : vector<8x128xf32>
    %2 = tpu.matmul %0, %1, %cst {dimension_numbers = #tpu.dot_dimension_numbers<[1], [0], [0], [1], [0, 0, 1, 1], [], []>} : vector<8x32xf32>, vector<32x128xf32>, vector<8x128xf32> -> vector<8x128xf32>
    %c0_3 = arith.constant 0 : index
    %c0_4 = arith.constant 0 : index
    %3 = vector.load %arg3[%c0_3, %c0_4] : memref<1x128xf32, #tpu.memory_space<vmem>>, vector<1x128xf32>
    %4 = vector.broadcast %3 : vector<1x128xf32> to vector<8x128xf32>
    %5 = arith.addf %2, %4 : vector<8x128xf32>
    %c0_5 = arith.constant 0 : index
    %c0_6 = arith.constant 0 : index
    %6 = vector.load %arg6[%c0_5, %c0_6] : memref<8x128xf32, #tpu.memory_space<vmem>>, vector<8x128xf32>
    tpu.vector_store %arg6[%c0_5, %c0_6], %5 {strides = array<i32>} : memref<8x128xf32, #tpu.memory_space<vmem>>, vector<8x128xf32>,
    %c0_7 = arith.constant 0 : index
    %c0_8 = arith.constant 0 : index
    %7 = vector.load %arg4[%c0_7, %c0_8] : memref<1x128xf32, #tpu.memory_space<vmem>>, vector<1x128xf32>
    %8 = vector.broadcast %7 : vector<1x128xf32> to vector<8x128xf32>
    %9 = arith.mulf %5, %8 : vector<8x128xf32>
    %c0_9 = arith.constant 0 : index
    %c0_10 = arith.constant 0 : index
    %10 = vector.load %arg5[%c0_9, %c0_10] : memref<1x128xf32, #tpu.memory_space<vmem>>, vector<1x128xf32>
    %11 = vector.broadcast %10 : vector<1x128xf32> to vector<8x128xf32>
    %12 = arith.addf %9, %11 : vector<8x128xf32>
    %c0_11 = arith.constant 0 : index
    %c0_12 = arith.constant 0 : index
    %13 = vector.load %arg7[%c0_11, %c0_12] : memref<8x128xf32, #tpu.memory_space<vmem>>, vector<8x128xf32>
    tpu.vector_store %arg7[%c0_11, %c0_12], %12 {strides = array<i32>} : memref<8x128xf32, #tpu.memory_space<vmem>>, vector<8x128xf32>,
    return
  }
  func.func @transform_0(%arg0: i32) -> (i32, i32) {
    %c0_i32 = arith.constant 0 : i32
    %c0_i32_0 = arith.constant 0 : i32
    return %arg0, %c0_i32 : i32, i32
  }
  func.func @transform_1(%arg0: i32) -> (i32, i32) {
    %c0_i32 = arith.constant 0 : i32
    %c0_i32_0 = arith.constant 0 : i32
    %c0_i32_1 = arith.constant 0 : i32
    return %c0_i32, %c0_i32_0 : i32, i32
  }
  func.func @transform_2(%arg0: i32) -> (i32, i32) {
    %c0_i32 = arith.constant 0 : i32
    %c0_i32_0 = arith.constant 0 : i32
    %c0_i32_1 = arith.constant 0 : i32
    return %c0_i32, %c0_i32_0 : i32, i32
  }
  func.func @transform_3(%arg0: i32) -> (i32, i32) {
    %c0_i32 = arith.constant 0 : i32
    %c0_i32_0 = arith.constant 0 : i32
    %c0_i32_1 = arith.constant 0 : i32
    return %c0_i32, %c0_i32_0 : i32, i32
  }
  func.func @transform_4(%arg0: i32) -> (i32, i32) {
    %c0_i32 = arith.constant 0 : i32
    %c0_i32_0 = arith.constant 0 : i32
    %c0_i32_1 = arith.constant 0 : i32
    return %c0_i32, %c0_i32_0 : i32, i32
  }
  func.func @transform_5(%arg0: i32) -> (i32, i32) {
    %c0_i32 = arith.constant 0 : i32
    %c0_i32_0 = arith.constant 0 : i32
    return %arg0, %c0_i32 : i32, i32
  }
  func.func @transform_6(%arg0: i32) -> (i32, i32) {
    %c0_i32 = arith.constant 0 : i32
    %c0_i32_0 = arith.constant 0 : i32
    return %arg0, %c0_i32 : i32, i32
  }
}

</mosaic_0001>

<bundles_post_ra>
// kernel: tpu_custom_call.1
= control target key start
LH: loop header
LB: loop body
LE: loop exit
PB: predicated region body
PF: predicated region fallthrough
CT: control target
= control target key end

     0   :  { %12 = vsyncpa [#allocation3], 0  ;;  %s423_s0 = inlined_call_operand.hbm [shape: f32[8,32], index: 0, kind: input, shape index: {}]   ;;  %s424_s1 = inlined_call_operand.hbm [shape: f32[32,128], index: 1, kind: input, shape index: {}]   ;;  %s425_s2 = inlined_call_operand.vmem [shape: f32[1,128], index: 2, kind: input, shape index: {}]   ;;  %s426_s3 = inlined_call_operand.vmem [shape: f32[1,128], index: 3, kind: input, shape index: {}]   ;;  %s427_s4 = inlined_call_operand.vmem [shape: f32[1,128], index: 4, kind: input, shape index: {}]   ;;  %s428_s5 = inlined_call_operand.hbm [shape: f32[8,128], index: 5, kind: output, shape index: {0}]   ;;  %s429_s6 = inlined_call_operand.hbm [shape: f32[8,128], index: 6, kind: output, shape index: {1}]  }
   0x1   :  { %13 = vsyncpa [#allocation6], 0 }
   0x2   :  { %14 = vsyncpa [#allocation4], 0 }
   0x3   :  { %15 = vsyncpa [#allocation9], 0  ;;  %s315_s21 = smov [#allocation2]   ;;  %s316_s23 = smov [#allocation5]  }
   0x4   :  { %s22_s22 = sshll.u32 %s315_s21, 4  ;;  %s31_s24 = sshll.u32 %s316_s23, 4  ;;  %s23_s22 = int_to_ptr.vmem [resolvable:$true] %s22_s22  ;;  %s359_s24 = int_to_ptr.vmem [resolvable:$true] %s31_s24 }
   0x5   :  { %s219_s27 = scalar_lea.hbm %s423_s0, 128 }
   0x6   :  { %p220_p0 = scmp.ne.s32.totalorder %s423_s0, %s219_s27  ;;  %p223_p1 = scmp.lt.u32.totalorder %s219_s27, %s423_s0 }
   0x8   :  { %p225_p2 = pnand %p223_p1, %p220_p0 }
   0xa   :  { %228 = shalt.err (!%p225_p2)
}
   0xb   :  { %s229_s8 = scalar_lea.vmem %s23_s22, 128  ;;  %p234_p4 = scmp.lt.s32.totalorder %s23_s22, %s23_s22 }
   0xc   :  { %p230_p3 = scmp.ne.s32.totalorder %s23_s22, %s229_s8  ;;  %p235_p5 = scmp.lt.s32.totalorder %s229_s8, %s229_s8 }
   0xe   :  { %p236_p6 = por %p235_p5, %p234_p4 }
  0x10   :  { %p237_p7 = pnand %p236_p6, %p230_p3 }
  0x12   :  { %240 = shalt.err (!%p237_p7)
}
  0x13   :  { %25 = dma.hbm_to_vmem [thread:$0]  %s423_s0, 128, %s23_s22, [#allocation3]  }
  0x14   :  { %s241_s13 = scalar_lea.hbm %s424_s1, 512 }
  0x15   :  { %p242_p8 = scmp.ne.s32.totalorder %s424_s1, %s241_s13  ;;  %p245_p9 = scmp.lt.u32.totalorder %s241_s13, %s424_s1 }
  0x17   :  { %p247_p10 = pnand %p245_p9, %p242_p8 }
  0x19   :  { %250 = shalt.err (!%p247_p10)
}
  0x1a   :  { %s251_s18 = scalar_lea.vmem %s359_s24, 512  ;;  %p256_p12 = scmp.lt.s32.totalorder %s359_s24, %s359_s24 }
  0x1b   :  { %p252_p11 = scmp.ne.s32.totalorder %s359_s24, %s251_s18  ;;  %p257_p13 = scmp.lt.s32.totalorder %s251_s18, %s251_s18 }
  0x1d   :  { %p258_p0 = por %p257_p13, %p256_p12 }
  0x1f   :  { %p259_p1 = pnand %p258_p0, %p252_p11 }
  0x21   :  { %262 = shalt.err (!%p259_p1)
}
  0x22   :  { %s317_s0 = smov 128   ;;  %s318_s19 = smov 8  }
  0x23   :  { %37 = dma.hbm_to_vmem [thread:$0]  %s424_s1, 512, %s359_s24, [#allocation6], %s317_s0, %s317_s0, %s318_s19  }
  0x24   :  { %307 = dma.done.wait [#allocation3], 128  }
  0x25   :  { %308 = vsyncadd [#allocation3], 4294967168 }
  0x26   :  { %309 = dma.done.wait [#allocation6], 512  }
  0x27   :  { %310 = vsyncadd [#allocation6], 4294966784  ;;  %v319_v0 = vmov 0.0|0.0   ;;  %vm320_vm0 = vmmov 0   ;;  %v321_v1 = vmov 0.0   ;;  %v51_v2 = vld [vmem:[#allocation5] sm:$0xff] }
  0x28   :  { %204 = vmatprep.subr.bf16.mxu0 %v319_v0  ;;  %201 = vmatprep.mubr.msk.f32.mxu0 %vm320_vm0, %v321_v1  ;;  %v52_v3 = vld [vmem:[#allocation5 + $0x8] sm:$0xff]  ;;  %v53_v4 = vld [vmem:[#allocation5 + $0x10] sm:$0xff]  ;;  %v54_v6 = vld [vmem:[#allocation5 + $0x18] sm:$0xff]  ;;  %vm62_vm1 = vcmask 261120   ;;  %s322_s23 = smov [#allocation7]   ;;  %s323_s29 = smov [#allocation8]  }
  0x29   :  { %v205_v5 = vpack.c.bf16 %v52_v3, %v51_v2  ;;  %v208_v7 = vpack.c.bf16 %v54_v6, %v53_v4  ;;  %v50_v8 = vld [vmem:[#allocation2] sm:$0xff]  ;;  %s160_s24 = sshll.u32 %s322_s23, 4  ;;  %s170_s30 = sshll.u32 %s323_s29, 4  ;;  %s161_s24 = int_to_ptr.vmem [resolvable:$true] %s160_s24  ;;  %s171_s30 = int_to_ptr.vmem [resolvable:$true] %s170_s30 }
  0x2a   :  { %v184_v9 = vld [vmem:[%s425_s2] ss:$0 sm:$0xff]  ;;  %s263_s7 = scalar_lea.vmem %s161_s24, 128  ;;  %p268_p3 = scmp.lt.s32.totalorder %s161_s24, %s161_s24 }
  0x2b   :  { %206 = vmatpush3.bf16.msra.mxu0 %v205_v5  ;;  %v186_v11 = vld [vmem:[%s426_s3] ss:$0 sm:$0xff]  ;;  %p264_p2 = scmp.ne.s32.totalorder %s161_s24, %s263_s7  ;;  %p269_p4 = scmp.lt.s32.totalorder %s263_s7, %s263_s7 }
  0x2c   :  { %207 = vmatprep.subr.bf16.mxu0 %v319_v0  ;;  %v187_v14 = vld [vmem:[%s427_s4] ss:$0 sm:$0xff] }
  0x2d   :  { %p270_p5 = por %p269_p4, %p268_p3 }
  0x2f   :  { %209 = vmatpush3.bf16.msra.mxu0 %v208_v7  ;;  %p271_p6 = pnand %p270_p5, %p264_p2 }
  0x32   :  { %202 = vmatmul.mubr.msk.f32.vlgmr.msra.gmra.mrb[0].mxu0 %vm62_vm1, %v50_v8 }
 0x105   :  { %v132_v10 = vpop.f32.mrb[0].mxu0 }
 0x106   :  { %v133_v12 = vadd.f32 %v184_v9, %v132_v10  ;;  %v203_v13 = vpop.f32.mrb[1].mxu0 }
 0x108   :  { %v144_v15 = vmul.f32 %v186_v11, %v133_v12  ;;  %136 = vst [vmem:[#allocation7] sm:$0xff] %v133_v12 }
 0x109   :  { %274 = shalt.err (!%p271_p6)
}
 0x10a   :  { %s275_s8 = scalar_lea.hbm %s428_s5, 128 }
 0x10b   :  { %p276_p7 = scmp.ne.s32.totalorder %s428_s5, %s275_s8  ;;  %p279_p8 = scmp.lt.u32.totalorder %s275_s8, %s428_s5 }
 0x10d   :  { %p281_p9 = pnand %p279_p8, %p276_p7 }
 0x10f   :  { %284 = shalt.err (!%p281_p9)
}
 0x110   :  { %163 = dma.vmem_to_hbm [thread:$0]  %s161_s24, 128, %s428_s5, [#allocation4]   ;;  %v152_v16 = vadd.f32 %v187_v14, %v144_v15 }
 0x111   :  { %s285_s14 = scalar_lea.vmem %s171_s30, 128  ;;  %p290_p11 = scmp.lt.s32.totalorder %s171_s30, %s171_s30 }
 0x112   :  { %153 = vst [vmem:[#allocation8] sm:$0xff] %v152_v16  ;;  %p286_p10 = scmp.ne.s32.totalorder %s171_s30, %s285_s14  ;;  %p291_p12 = scmp.lt.s32.totalorder %s285_s14, %s285_s14 }
 0x114   :  { %p292_p13 = por %p291_p12, %p290_p11 }
 0x116   :  { %p293_p0 = pnand %p292_p13, %p286_p10 }
 0x118   :  { %296 = shalt.err (!%p293_p0)
}
 0x119   :  { %s297_s17 = scalar_lea.hbm %s429_s6, 128 }
 0x11a   :  { %p298_p1 = scmp.ne.s32.totalorder %s429_s6, %s297_s17  ;;  %p301_p2 = scmp.lt.u32.totalorder %s297_s17, %s429_s6 }
 0x11c   :  { %p303_p3 = pnand %p301_p2, %p298_p1 }
 0x11e   :  { %306 = shalt.err (!%p303_p3)
}
 0x11f   :  { %173 = dma.vmem_to_hbm [thread:$0]  %s171_s30, 128, %s429_s6, [#allocation9]  }
 0x120   :  { %311 = dma.done.wait [#allocation4], 128  }
 0x121   :  { %312 = vsyncadd [#allocation4], 4294967168 }
 0x122   :  { %313 = dma.done.wait [#allocation9], 128  }
 0x123   :  { %314 = vsyncadd [#allocation9], 4294967168 }
 0x124   :  { %180 = vsyncpa [#allocation3], 1 }
 0x125   :  { %181 = vsyncpa [#allocation6], 1 }
 0x126   :  { %182 = vsyncpa [#allocation4], 1 }
 0x127   :  { %183 = vsyncpa [#allocation9], 1 }

</bundles_post_ra>
